<compile_context>
chip_gen: v7x
topology: tpu7x:2x2x1
jax: 0.10.0
libtpu: 0.0.40
codegen_flags: <defaults>
</compile_context>

<pallas_src>
import functools
import math

import jax
import jax.numpy as jnp
from jax import lax
from jax.experimental import pallas as pl
from jax.experimental.pallas import tpu as pltpu


# ----------------------------------------------------------------------------
# Tile-size / VMEM helpers
# ----------------------------------------------------------------------------
def _pick_tile(dim, target, granules):
    """Largest multiple of a granule <= target that divides dim, else full dim."""
    if dim <= target:
        return dim
    for g in granules:
        t = (min(target, dim) // g) * g
        while t >= g:
            if dim % t == 0:
                return t
            t -= g
    return dim


def _vmem_limit(*working_set_bytes):
    """Double-buffered working set + headroom, capped below v7x's 64 MiB VMEM."""
    need = 2 * int(sum(working_set_bytes)) + (8 << 20)
    return int(min(max(need, 16 << 20), 48 << 20))


# ----------------------------------------------------------------------------
# Tiled linear (no bias): y = x @ w   with x:(M,K), w:(K,N)
# ----------------------------------------------------------------------------
def _matmul_kernel(x_ref, w_ref, o_ref, acc_ref):
    @pl.when(pl.program_id(2) == 0)
    def _init():
        acc_ref[...] = jnp.zeros_like(acc_ref)

    acc_ref[...] += jnp.dot(
        x_ref[...], w_ref[...], preferred_element_type=jnp.float32
    )

    @pl.when(pl.program_id(2) == pl.num_programs(2) - 1)
    def _finalize():
        o_ref[...] = acc_ref[...].astype(o_ref.dtype)


def matmul_pallas(x2d, w, *, tm_target=256, tn_target=256, tk_target=512):
    M, K = x2d.shape
    K2, N = w.shape
    assert K == K2

    tm = _pick_tile(M, tm_target, (8,))      # sublane dim of x / out
    tn = _pick_tile(N, tn_target, (128,))    # lane dim of w / out
    tk = _pick_tile(K, tk_target, (128,))    # lane dim of x, sublane dim of w

    dsize = jnp.dtype(x2d.dtype).itemsize
    tile_bytes = (tm * tk + tk * tn + tm * tn) * dsize + tm * tn * 4

    cost = pl.CostEstimate(
        flops=2 * M * N * K,
        transcendentals=0,
        bytes_accessed=(M * K + K * N + M * N) * dsize,
    )

    return pl.pallas_call(
        _matmul_kernel,
        out_shape=jax.ShapeDtypeStruct((M, N), x2d.dtype),
        grid_spec=pltpu.PrefetchScalarGridSpec(
            num_scalar_prefetch=0,
            grid=(M // tm, N // tn, K // tk),
            in_specs=[
                pl.BlockSpec((tm, tk), lambda i, j, k: (i, k)),
                pl.BlockSpec((tk, tn), lambda i, j, k: (k, j)),
            ],
            out_specs=pl.BlockSpec((tm, tn), lambda i, j, k: (i, j)),
            scratch_shapes=[pltpu.VMEM((tm, tn), jnp.float32)],
        ),
        compiler_params=pltpu.CompilerParams(
            dimension_semantics=("parallel", "parallel", "arbitrary"),
            vmem_limit_bytes=_vmem_limit(tile_bytes),
        ),
        cost_estimate=cost,
    )(x2d, w)


# ----------------------------------------------------------------------------
# Flash-style scaled-dot-product attention with masked (online) softmax.
# Grid = (batch, head, q_tile, kv_tile); kv_tile is the reduction axis.
# ----------------------------------------------------------------------------
def _flash_attn_kernel(vlens_ref, q_ref, k_ref, v_ref, o_ref,
                       m_sc, l_sc, acc_sc, *, sm_scale, kv_tile):
    b = pl.program_id(0)
    ki = pl.program_id(3)

    @pl.when(ki == 0)
    def _init():
        m_sc[...] = jnp.full_like(m_sc, -jnp.inf)
        l_sc[...] = jnp.zeros_like(l_sc)
        acc_sc[...] = jnp.zeros_like(acc_sc)

    # Fold 1/sqrt(d) into the small (tq, Dh) query tile (cheaper than scaling
    # the (tq, tk) scores).
    q = q_ref[...] * sm_scale
    # QK^T contracting the last dims directly (no explicit K transpose).
    s = lax.dot_general(
        q, k_ref[...],
        dimension_numbers=(((1,), (1,)), ((), ())),
        preferred_element_type=jnp.float32,
    )  # (tq, tk)

    # masked_softmax: positions >= valid_len are filled with -1e6 (matches the
    # reference; a fully-masked row therefore yields a uniform distribution,
    # exactly like the PyTorch code). The -1e6 fill also keeps the running
    # max/l finite for fully-masked KV tiles.
    vl = vlens_ref[b]
    col = ki * kv_tile + lax.broadcasted_iota(jnp.int32, s.shape, 1)
    s = jnp.where(col < vl, s, jnp.float32(-1.0e6))

    m_prev = m_sc[...]
    m_new = jnp.maximum(m_prev, jnp.max(s, axis=-1, keepdims=True))
    alpha = jnp.exp(m_prev - m_new)
    p = jnp.exp(s - m_new)
    l_sc[...] = alpha * l_sc[...] + jnp.sum(p, axis=-1, keepdims=True)
    acc_sc[...] = alpha * acc_sc[...] + jnp.dot(
        p.astype(v_ref.dtype), v_ref[...], preferred_element_type=jnp.float32
    )
    m_sc[...] = m_new

    @pl.when(ki == pl.num_programs(3) - 1)
    def _finalize():
        inv_l = pl.reciprocal(l_sc[...], approx=True)   # EUP, normalize once
        o_ref[...] = (acc_sc[...] * inv_l).astype(o_ref.dtype)


def dot_product_attention_pallas(q, k, v, valid_lens, *,
                                 q_tile_target=256, kv_tile_target=512):
    # q: (B, NH, Sq, Dh)   k, v: (B, NH, Sk, Dh)   valid_lens: (B,) int32
    B, NH, Sq, Dh = q.shape
    _, _, Sk, _ = k.shape

    tq = _pick_tile(Sq, q_tile_target, (8,))
    tk = _pick_tile(Sk, kv_tile_target, (128, 8))

    dsize = jnp.dtype(q.dtype).itemsize
    tile_bytes = ((tq * Dh + 2 * tk * Dh + tq * Dh) * dsize
                  + (tq * Dh + 2 * tq + tq * tk) * 4)

    cost = pl.CostEstimate(
        flops=4 * B * NH * Sq * Sk * Dh,
        transcendentals=B * NH * Sq * Sk,
        bytes_accessed=B * NH * (2 * Sq * Dh + 2 * Sk * Dh) * dsize,
    )

    kernel = functools.partial(
        _flash_attn_kernel, sm_scale=1.0 / math.sqrt(Dh), kv_tile=tk
    )
    blk_q = (pl.Squeezed(), pl.Squeezed(), tq, Dh)
    blk_kv = (pl.Squeezed(), pl.Squeezed(), tk, Dh)

    return pl.pallas_call(
        kernel,
        out_shape=jax.ShapeDtypeStruct((B, NH, Sq, Dh), q.dtype),
        grid_spec=pltpu.PrefetchScalarGridSpec(
            num_scalar_prefetch=1,
            grid=(B, NH, Sq // tq, Sk // tk),
            in_specs=[
                pl.BlockSpec(blk_q, lambda b, h, qi, ki, vl: (b, h, qi, 0)),
                pl.BlockSpec(blk_kv, lambda b, h, qi, ki, vl: (b, h, ki, 0)),
                pl.BlockSpec(blk_kv, lambda b, h, qi, ki, vl: (b, h, ki, 0)),
            ],
            out_specs=pl.BlockSpec(blk_q, lambda b, h, qi, ki, vl: (b, h, qi, 0)),
            scratch_shapes=[
                pltpu.VMEM((tq, 1), jnp.float32),    # running max m
                pltpu.VMEM((tq, 1), jnp.float32),    # running sum l
                pltpu.VMEM((tq, Dh), jnp.float32),   # output accumulator
            ],
        ),
        compiler_params=pltpu.CompilerParams(
            dimension_semantics=("parallel", "parallel", "parallel", "arbitrary"),
            vmem_limit_bytes=_vmem_limit(tile_bytes),
        ),
        cost_estimate=cost,
    )(valid_lens, q, k, v)


# ----------------------------------------------------------------------------
# MultiHeadAttention wrapper (reshapes / head split in plain JAX)
# ----------------------------------------------------------------------------
def split_heads(x, num_heads):
    B, S, H = x.shape
    x = x.reshape(B, S, num_heads, H // num_heads)
    return jnp.transpose(x, (0, 2, 1, 3))           # (B, NH, S, Dh)


def merge_heads(x):
    B, NH, S, Dh = x.shape
    return jnp.transpose(x, (0, 2, 1, 3)).reshape(B, S, NH * Dh)


def multi_head_attention(params, q_in, k_in, v_in, num_heads,
                         valid_lens=None, compute_dtype=None):
    """compute_dtype=jnp.bfloat16 casts matmul operands on v6e/v7x; softmax and
    accumulation stay in f32 inside the kernels."""
    B, Sq, Fq = q_in.shape
    _, Sk, Fk = k_in.shape
    _, Sv, Fv = v_in.shape
    H = params["W_q"].shape[1]
    assert H % num_heads == 0

    cast = (lambda a: a.astype(compute_dtype)) if compute_dtype is not None \
        else (lambda a: a)
    Wq, Wk, Wv, Wo = (cast(params[n]) for n in ("W_q", "W_k", "W_v", "W_o"))

    if (q_in is k_in) and (k_in is v_in):
        # Self-attention fast path: fused (F, 3H) projection -> one tiled
        # matmul; the activation is read from HBM once, 3H lane-dense output.
        w_qkv = jnp.concatenate([Wq, Wk, Wv], axis=1)
        qkv = matmul_pallas(cast(q_in).reshape(-1, Fq), w_qkv)      # (B*S, 3H)
        q = qkv[:, :H].reshape(B, Sq, H)
        k = qkv[:, H:2 * H].reshape(B, Sk, H)
        v = qkv[:, 2 * H:].reshape(B, Sv, H)
    else:
        q = matmul_pallas(cast(q_in).reshape(-1, Fq), Wq).reshape(B, Sq, H)
        k = matmul_pallas(cast(k_in).reshape(-1, Fk), Wk).reshape(B, Sk, H)
        v = matmul_pallas(cast(v_in).reshape(-1, Fv), Wv).reshape(B, Sv, H)

    q = split_heads(q, num_heads)   # (B, NH, Sq, Dh)
    k = split_heads(k, num_heads)
    v = split_heads(v, num_heads)

    if valid_lens is None:
        vlens = jnp.full((B,), Sk, dtype=jnp.int32)
    else:
        if valid_lens.ndim != 1:
            # TODO(synk): 2-D per-query valid_lens (reference masked_softmax
            # supports it) not implemented.
            raise NotImplementedError("only 1-D per-batch valid_lens supported")
        vlens = valid_lens.astype(jnp.int32)

    out = dot_product_attention_pallas(q, k, v, vlens)   # (B, NH, Sq, Dh)
    out_concat = merge_heads(out)                        # (B, Sq, H)

    out_final = matmul_pallas(out_concat.reshape(-1, H), Wo).reshape(B, Sq, H)
    if compute_dtype is not None:
        out_final = out_final.astype(q_in.dtype)
    return out_final


# ----------------------------------------------------------------------------
# Deterministic parameter init (PyTorch Linear-style uniform, no bias)
# ----------------------------------------------------------------------------
def init_params(key, in_dim, num_hiddens):
    keys = jax.random.split(key, 4)

    def lin(k, fan_in, fan_out):
        bound = 1.0 / math.sqrt(fan_in)
        # stored as (in, out) so that y = x @ W
        return jax.random.uniform(
            k, (fan_in, fan_out), jnp.float32, minval=-bound, maxval=bound
        )

    return {
        "W_q": lin(keys[0], in_dim, num_hiddens),
        "W_k": lin(keys[1], in_dim, num_hiddens),
        "W_v": lin(keys[2], in_dim, num_hiddens),
        "W_o": lin(keys[3], num_hiddens, num_hiddens),
    }


# ----------------------------------------------------------------------------
# Pure-JAX reference (for a loose numerical sanity check of the kernels)
# ----------------------------------------------------------------------------
def _reference_mha(params, q_in, k_in, v_in, num_heads, valid_lens):
    B, Sq, _ = q_in.shape
    H = params["W_q"].shape[1]
    Dh = H // num_heads
    q = (q_in @ params["W_q"]).reshape(B, Sq, num_heads, Dh).transpose(0, 2, 1, 3)
    k = (k_in @ params["W_k"]).reshape(B, -1, num_heads, Dh).transpose(0, 2, 1, 3)
    v = (v_in @ params["W_v"]).reshape(B, -1, num_heads, Dh).transpose(0, 2, 1, 3)
    s = jnp.einsum("bhqd,bhkd->bhqk", q, k) / math.sqrt(Dh)
    if valid_lens is not None:
        col = jnp.arange(s.shape[-1])
        mask = col[None, None, None, :] < valid_lens[:, None, None, None]
        s = jnp.where(mask, s, jnp.float32(-1.0e6))
    w = jax.nn.softmax(s, axis=-1)
    o = jnp.einsum("bhqk,bhkd->bhqd", w, v)
    o = o.transpose(0, 2, 1, 3).reshape(B, Sq, H)
    return o @ params["W_o"]


if __name__ == "__main__":
    key = jax.random.PRNGKey(0)
    k_params, k_q, k_k, k_v = jax.random.split(key, 4)

    batch, seq, hidden, num_heads = 2, 8, 32, 4

    params = init_params(k_params, hidden, hidden)
    q = jax.random.normal(k_q, (batch, seq, hidden), jnp.float32)
    k = jax.random.normal(k_k, (batch, seq, hidden), jnp.float32)
    v = jax.random.normal(k_v, (batch, seq, hidden), jnp.float32)
    valid_lens = jnp.array([5, 8], dtype=jnp.int32)

    # Cross-attention style call (separate q/k/v projections).
    out = multi_head_attention(params, q, k, v, num_heads, valid_lens)
    jax.block_until_ready(out)
    assert out.shape == (batch, seq, hidden)

    # Loose numerical sanity check against a pure-JAX reference.
    ref = _reference_mha(params, q, k, v, num_heads, valid_lens)
    err = float(jnp.max(jnp.abs(out - ref)))
    assert jnp.allclose(out, ref, rtol=2e-2, atol=2e-2), f"max abs err {err}"

    # Self-attention fast path (fused (F, 3H) projection).
    out_self = multi_head_attention(params, q, q, q, num_heads, valid_lens)
    jax.block_until_ready(out_self)
    assert out_self.shape == (batch, seq, hidden)

    print("KERNEL_OK")
</pallas_src>

<mosaic_0001>
module attributes {stable_mosaic.version = 11 : i64} {
  func.func @_matmul_kernel(%arg0: i32, %arg1: i32, %arg2: i32, %arg3: memref<16x32xf32, #tpu.memory_space<vmem>>, %arg4: memref<32x32xf32, #tpu.memory_space<vmem>>, %arg5: memref<16x32xf32, #tpu.memory_space<vmem>>, %arg6: memref<16x32xf32, #tpu.memory_space<vmem>>) attributes {dimension_semantics = [#tpu.dimension_semantics<parallel>, #tpu.dimension_semantics<parallel>, #tpu.dimension_semantics<arbitrary>], iteration_bounds = array<i64: 1, 1, 1>, scalar_prefetch = 0 : i64, scratch_operands = 1 : i64, tpu.core_type = #tpu.core_type<tc>, window_params = [{transform_indices = @transform_0, window_bounds = array<i64: 16, 32>}, {transform_indices = @transform_1, window_bounds = array<i64: 32, 32>}, {transform_indices = @transform_2, window_bounds = array<i64: 16, 32>}]} {
    %c0_i32 = arith.constant 0 : i32
    %0 = arith.cmpi eq, %arg2, %c0_i32 : i32
    %1 = arith.extui %0 : i1 to i32
    %c0_i32_0 = arith.constant 0 : i32
    %2 = arith.cmpi ne, %1, %c0_i32_0 : i32
    scf.if %2 {
      %cst_10 = arith.constant 0.000000e+00 : f32
      %12 = vector.broadcast %cst_10 : f32 to vector<16x32xf32>
      %c0_11 = arith.constant 0 : index
      %c0_12 = arith.constant 0 : index
      %13 = vector.load %arg6[%c0_11, %c0_12] : memref<16x32xf32, #tpu.memory_space<vmem>>, vector<16x32xf32>
      tpu.vector_store %arg6[%c0_11, %c0_12], %12 {strides = array<i32>} : memref<16x32xf32, #tpu.memory_space<vmem>>, vector<16x32xf32>,
    } else {
    }
    %c0 = arith.constant 0 : index
    %c0_1 = arith.constant 0 : index
    %3 = vector.load %arg6[%c0, %c0_1] : memref<16x32xf32, #tpu.memory_space<vmem>>, vector<16x32xf32>
    %c0_2 = arith.constant 0 : index
    %c0_3 = arith.constant 0 : index
    %4 = vector.load %arg3[%c0_2, %c0_3] : memref<16x32xf32, #tpu.memory_space<vmem>>, vector<16x32xf32>
    %c0_4 = arith.constant 0 : index
    %c0_5 = arith.constant 0 : index
    %5 = vector.load %arg4[%c0_4, %c0_5] : memref<32x32xf32, #tpu.memory_space<vmem>>, vector<32x32xf32>
    %cst = arith.constant dense<0.000000e+00> : vector<16x32xf32>
    %6 = tpu.matmul %4, %5, %cst {dimension_numbers = #tpu.dot_dimension_numbers<[1], [0], [0], [1], [0, 0, 1, 1], [], []>} : vector<16x32xf32>, vector<32x32xf32>, vector<16x32xf32> -> vector<16x32xf32>
    %7 = arith.addf %3, %6 : vector<16x32xf32>
    %c0_6 = arith.constant 0 : index
    %c0_7 = arith.constant 0 : index
    %8 = vector.load %arg6[%c0_6, %c0_7] : memref<16x32xf32, #tpu.memory_space<vmem>>, vector<16x32xf32>
    tpu.vector_store %arg6[%c0_6, %c0_7], %7 {strides = array<i32>} : memref<16x32xf32, #tpu.memory_space<vmem>>, vector<16x32xf32>,
    %c0_i32_8 = arith.constant 0 : i32
    %9 = arith.cmpi eq, %arg2, %c0_i32_8 : i32
    %10 = arith.extui %9 : i1 to i32
    %c0_i32_9 = arith.constant 0 : i32
    %11 = arith.cmpi ne, %10, %c0_i32_9 : i32
    scf.if %11 {
      %c0_10 = arith.constant 0 : index
      %c0_11 = arith.constant 0 : index
      %12 = vector.load %arg6[%c0_10, %c0_11] : memref<16x32xf32, #tpu.memory_space<vmem>>, vector<16x32xf32>
      %c0_12 = arith.constant 0 : index
      %c0_13 = arith.constant 0 : index
      %13 = vector.load %arg5[%c0_12, %c0_13] : memref<16x32xf32, #tpu.memory_space<vmem>>, vector<16x32xf32>
      tpu.vector_store %arg5[%c0_12, %c0_13], %12 {strides = array<i32>} : memref<16x32xf32, #tpu.memory_space<vmem>>, vector<16x32xf32>,
    } else {
    }
    return
  }
  func.func @transform_0(%arg0: i32, %arg1: i32, %arg2: i32) -> (i32, i32) {
    %c0_i32 = arith.constant 0 : i32
    return %arg0, %arg2 : i32, i32
  }
  func.func @transform_1(%arg0: i32, %arg1: i32, %arg2: i32) -> (i32, i32) {
    %c0_i32 = arith.constant 0 : i32
    return %arg2, %arg1 : i32, i32
  }
  func.func @transform_2(%arg0: i32, %arg1: i32, %arg2: i32) -> (i32, i32) {
    %c0_i32 = arith.constant 0 : i32
    return %arg0, %arg1 : i32, i32
  }
}

</mosaic_0001>

<bundles_post_ra>
// kernel: tpu_custom_call.1
= control target key start
LH: loop header
LB: loop body
LE: loop exit
PB: predicated region body
PF: predicated region fallthrough
CT: control target
= control target key end

     0   :  { %7 = vsyncpa [#allocation4], 0  ;;  %s345_s0 = inlined_call_operand.hbm [shape: f32[16,32], index: 0, kind: input, shape index: {}]   ;;  %s346_s1 = inlined_call_operand.hbm [shape: f32[32,32], index: 1, kind: input, shape index: {}]   ;;  %s347_s2 = inlined_call_operand.hbm [shape: f32[16,32], index: 2, kind: output, shape index: {}]  }
   0x1   :  { %8 = vsyncpa [#allocation7], 0 }
   0x2   :  { %9 = vsyncpa [#allocation5], 0  ;;  %s271_s9 = smov [#allocation3]   ;;  %s199_s13 = scalar_lea.hbm %s345_s0, 256 }
   0x3   :  { %s15_s10 = sshll.u32 %s271_s9, 4  ;;  %p200_p0 = scmp.ne.s32.totalorder %s345_s0, %s199_s13  ;;  %s16_s10 = int_to_ptr.vmem [resolvable:$true] %s15_s10 }
   0x4   :  { %p203_p1 = scmp.lt.u32.totalorder %s199_s13, %s345_s0 }
   0x6   :  { %p205_p2 = pnand %p203_p1, %p200_p0 }
   0x8   :  { %208 = shalt.err (!%p205_p2)
}
   0x9   :  { %s209_s18 = scalar_lea.vmem %s16_s10, 256  ;;  %p214_p4 = scmp.lt.s32.totalorder %s16_s10, %s16_s10 }
   0xa   :  { %p210_p3 = scmp.ne.s32.totalorder %s16_s10, %s209_s18  ;;  %p215_p5 = scmp.lt.s32.totalorder %s209_s18, %s209_s18 }
   0xc   :  { %p216_p6 = por %p215_p5, %p214_p4 }
   0xe   :  { %p217_p7 = pnand %p216_p6, %p210_p3 }
  0x10   :  { %220 = shalt.err (!%p217_p7)
}
  0x11   :  { %s272_s19 = smov 128   ;;  %s273_s20 = smov 8  }
  0x12   :  { %21 = dma.hbm_to_vmem [thread:$0]  %s345_s0, 256, %s16_s10, [#allocation4], %s272_s19, %s272_s19, %s273_s20  }
  0x13   :  { %s274_s23 = smov [#allocation6]   ;;  %s221_s27 = scalar_lea.hbm %s346_s1, 512 }
  0x14   :  { %s27_s24 = sshll.u32 %s274_s23, 4  ;;  %p222_p8 = scmp.ne.s32.totalorder %s346_s1, %s221_s27  ;;  %s28_s24 = int_to_ptr.vmem [resolvable:$true] %s27_s24 }
  0x15   :  { %p225_p9 = scmp.lt.u32.totalorder %s221_s27, %s346_s1 }
  0x17   :  { %p227_p10 = pnand %p225_p9, %p222_p8 }
  0x19   :  { %230 = shalt.err (!%p227_p10)
}
  0x1a   :  { %s231_s4 = scalar_lea.vmem %s28_s24, 512  ;;  %p236_p12 = scmp.lt.s32.totalorder %s28_s24, %s28_s24 }
  0x1b   :  { %p232_p11 = scmp.ne.s32.totalorder %s28_s24, %s231_s4  ;;  %p237_p13 = scmp.lt.s32.totalorder %s231_s4, %s231_s4 }
  0x1d   :  { %p238_p0 = por %p237_p13, %p236_p12 }
  0x1f   :  { %p239_p1 = pnand %p238_p0, %p232_p11 }
  0x21   :  { %242 = shalt.err (!%p239_p1)
}
  0x22   :  { %33 = dma.hbm_to_vmem [thread:$0]  %s346_s1, 512, %s28_s24, [#allocation7], %s272_s19, %s272_s19, %s273_s20  }
  0x23   :  { %265 = dma.done.wait [#allocation4], 256  }
  0x24   :  { %266 = vsyncadd [#allocation4], 4294967040 }
  0x25   :  { %267 = dma.done.wait [#allocation7], 512  }
  0x26   :  { %268 = vsyncadd [#allocation7], 4294966784  ;;  %vm44_vm0 = vcmask 261120   ;;  %v275_v0 = vmov 0.0   ;;  %v51_v1 = vld [vmem:[#allocation6] sm:$0xff]  ;;  %v52_v2 = vld [vmem:[#allocation6 + $0x8] sm:$0xff] }
  0x27   :  { %46 = vst.msk [vmem:[#allocation2 + $0x8] sm:$0xff] %vm44_vm0, %v275_v0  ;;  %45 = vst.msk [vmem:[#allocation2] sm:$0xff] %vm44_vm0, %v275_v0  ;;  %v53_v3 = vld [vmem:[#allocation6 + $0x10] sm:$0xff]  ;;  %v185_v4 = vpack.c.bf16 %v52_v2, %v51_v1  ;;  %v54_v5 = vld [vmem:[#allocation6 + $0x18] sm:$0xff]  ;;  %s276_s1 = smov [#allocation8]  }
  0x28   :  { %v49_v6 = vld [vmem:[#allocation3] sm:$0xff]  ;;  %v189_v7 = vpack.c.bf16 %v54_v5, %v53_v3  ;;  %v50_v8 = vld [vmem:[#allocation3 + $0x8] sm:$0xff]  ;;  %s153_s6 = sshll.u32 %s276_s1, 4  ;;  %s154_s6 = int_to_ptr.vmem [resolvable:$true] %s153_s6 }
  0x29   :  { %182 = vmatprep.mubr.msk.f32.mxu0 %vm44_vm0, %v49_v6  ;;  %186 = vmatprep.subr.bf16.mxu0 %v185_v4  ;;  %s243_s7 = scalar_lea.vmem %s154_s6, 256  ;;  %p248_p3 = scmp.lt.s32.totalorder %s154_s6, %s154_s6 }
  0x2a   :  { %188 = vmatpush3.bf16.msra.mxu0 %v185_v4  ;;  %p244_p2 = scmp.ne.s32.totalorder %s154_s6, %s243_s7  ;;  %p249_p4 = scmp.lt.s32.totalorder %s243_s7, %s243_s7 }
  0x2b   :  { %190 = vmatprep.subr.bf16.mxu0 %v189_v7 }
  0x2c   :  { %p250_p5 = por %p249_p4, %p248_p3 }
  0x2e   :  { %192 = vmatpush3.bf16.msra.mxu0 %v189_v7  ;;  %v48_v9 = vld [vmem:[#allocation2 + $0x8] sm:$0xff]  ;;  %v47_v10 = vld [vmem:[#allocation2] sm:$0xff]  ;;  %p251_p6 = pnand %p250_p5, %p244_p2 }
  0x31   :  { %183 = vmatmul.mubr.msk.f32.vlgmr.msra.gmra.mrb[0].mxu0 %vm44_vm0, %v50_v8 }
 0x104   :  { %v184_v11 = vpop.f32.mrb[0].mxu0 }
 0x105   :  { %v138_v12 = vadd.f32 %v184_v11, %v48_v9  ;;  %v128_v13 = vpop.f32.mrb[1].mxu0 }
 0x106   :  { %v137_v14 = vadd.f32 %v128_v13, %v47_v10 }
 0x107   :  { %140 = vst.msk [vmem:[#allocation2 + $0x8] sm:$0xff] %vm44_vm0, %v138_v12 }
 0x108   :  { %139 = vst.msk [vmem:[#allocation2] sm:$0xff] %vm44_vm0, %v137_v14 }
 0x10e   :  { %v145_v15 = vld [vmem:[#allocation2 + $0x8] sm:$0xff] }
 0x10f   :  { %v144_v16 = vld [vmem:[#allocation2] sm:$0xff]  ;;  %147 = vst.msk [vmem:[#allocation8 + $0x8] sm:$0xff] %vm44_vm0, %v145_v15 }
 0x110   :  { %146 = vst.msk [vmem:[#allocation8] sm:$0xff] %vm44_vm0, %v144_v16 }
 0x111   :  { %254 = shalt.err (!%p251_p6)
}
 0x112   :  { %s255_s10 = scalar_lea.hbm %s347_s2, 256 }
 0x113   :  { %p256_p7 = scmp.ne.s32.totalorder %s347_s2, %s255_s10  ;;  %p259_p8 = scmp.lt.u32.totalorder %s255_s10, %s347_s2 }
 0x115   :  { %p261_p9 = pnand %p259_p8, %p256_p7 }
 0x117   :  { %264 = shalt.err (!%p261_p9)
}
 0x118   :  { %159 = dma.vmem_to_hbm [thread:$0]  %s154_s6, 256, %s347_s2, [#allocation5], %s272_s19, %s272_s19, %s273_s20  }
 0x119   :  { %269 = dma.done.wait [#allocation5], 256  }
 0x11a   :  { %270 = vsyncadd [#allocation5], 4294967040 }
 0x11b   :  { %163 = vsyncpa [#allocation4], 1 }
 0x11c   :  { %164 = vsyncpa [#allocation7], 1 }
 0x11d   :  { %165 = vsyncpa [#allocation5], 1 }

</bundles_post_ra>
